<compile_context>
chip_gen: v6e
topology: v6e:2x2x1
jax: 0.10.0
libtpu: 0.0.40
codegen_flags: <defaults>
</compile_context>

<pallas_src>
import functools
import math

import jax
import jax.numpy as jnp
import numpy as np
from jax import lax
from jax.experimental import pallas as pl
from jax.experimental.pallas import tpu as pltpu

_LANES = 128
_INT32_MAX = np.int32(np.iinfo(np.int32).max)
_INT32_MIN = np.int32(np.iinfo(np.int32).min)
_F32_INF = np.float32(np.inf)

_TILE_BYTES = 4 * 1024 * 1024        # per-input-buffer budget (double-buffered)
_VMEM_LIMIT = 32 * 1024 * 1024       # <= scoped default on v7x, < physical on all


def _key_spec(dtype):
    """Returns (compute_dtype, '-inf' sentinel, value -> sortable key fn)."""
    dtype = np.dtype(dtype)
    if jnp.issubdtype(dtype, jnp.floating):
        # TODO(synk): NaN is mapped to +inf, so a real +inf at a lower index
        # wins over a later NaN (torch would return the NaN's index).
        def key_fn(v):
            v = v.astype(jnp.float32)
            return jnp.where(jnp.isnan(v), _F32_INF, v)
        return jnp.float32, np.float32(-np.inf), key_fn
    if dtype == np.dtype(np.uint32):
        def key_fn(v):  # order-preserving uint32 -> int32 (flip the sign bit)
            return lax.bitcast_convert_type(v, jnp.int32) ^ jnp.int32(-2 ** 31)
        return jnp.int32, _INT32_MIN, key_fn

    def key_fn(v):      # bool / (u)int8 / (u)int16 / int32: exact in int32
        return v.astype(jnp.int32)
    return jnp.int32, _INT32_MIN, key_fn


# ----------------------------------------------------------------------------
# dim=None : streaming flattened argmax (carried accumulator, 2-way TC split)
# ----------------------------------------------------------------------------
def _argmax_flat_kernel(x_ref, val_ref, idx_ref, run_val, run_idx, *,
                        rows, tile_rows, compute_dtype, neg, key_fn,
                        needs_mask):
    c = pl.program_id(0)                       # core split ("parallel")
    i = pl.program_id(1)                       # row-block stream ("arbitrary")
    blk = c * pl.num_programs(1) + i           # logical row-block id

    @pl.when(i == 0)
    def _():
        run_val[...] = jnp.full(run_val.shape, neg, compute_dtype)
        run_idx[...] = jnp.full(run_idx.shape, _INT32_MAX, jnp.int32)

    key = key_fn(x_ref[...])                                   # (TR, 128)
    row = lax.broadcasted_iota(jnp.int32, key.shape, 0)        # local row only
    if needs_mask:
        # Only emitted when the grid does not tile `rows` exactly.
        key = jnp.where(blk * tile_rows + row < rows, key, neg)

    # Per-lane block maximum and the earliest local row achieving it.
    m_l = jnp.max(key, axis=0, keepdims=True)                  # (1, 128)
    cand = jnp.where(key == m_l, row, _INT32_MAX)
    blk_row = jnp.min(cand, axis=0, keepdims=True)             # (1, 128)
    lane = lax.broadcasted_iota(jnp.int32, (1, _LANES), 1)
    blk_idx = (blk_row + blk * tile_rows) * _LANES + lane      # global flat idx

    # Lexicographic (value desc, index asc) per-lane running update.
    better = (m_l > run_val[...]) | ((m_l == run_val[...]) &
                                     (blk_idx < run_idx[...]))
    run_val[...] = jnp.where(better, m_l, run_val[...])
    run_idx[...] = jnp.where(better, blk_idx, run_idx[...])

    @pl.when(i == pl.num_programs(1) - 1)
    def _():
        # Broadcast to 8 sublanes so the per-core partial output block is a
        # legal (8, 128) tile; duplicates are harmless in the final combine.
        val_ref[...] = jnp.broadcast_to(run_val[...], val_ref.shape)
        idx_ref[...] = jnp.broadcast_to(run_idx[...], idx_ref.shape)


def _argmax_flat(x):
    n = math.prod(x.shape) if x.shape else 1
    cdt, neg, key_fn = _key_spec(x.dtype)
    flat = x.reshape(-1)
    rows = n // _LANES
    tail = n - rows * _LANES

    if rows == 0:
        # Fewer than 128 elements: not worth a kernel launch.
        return jnp.argmax(key_fn(flat)).astype(jnp.int32)

    # TODO(synk): for misaligned n the aligned prefix is a slice (XLA may copy
    # it); only the <128-element tail is handled outside the kernel.
    main = flat if tail == 0 else flat[:rows * _LANES]
    x2 = main.reshape(rows, _LANES)

    itemsize = np.dtype(x.dtype).itemsize
    cap = max(8, (_TILE_BYTES // (_LANES * itemsize)) // 8 * 8)
    tile_rows = rows if rows <= cap else cap          # == rows or multiple of 8
    num_blocks = pl.cdiv(rows, tile_rows)

    # v7x: split the streamed reduction across the 2 TensorCores; on 1-TC
    # chips the leading "parallel" axis just runs sequentially (same code).
    ncores = 2 if num_blocks >= 8 else 1
    nb_per = pl.cdiv(num_blocks, ncores)
    needs_mask = (ncores * nb_per * tile_rows) != rows
    last_block = num_blocks - 1

    def in_map(c, i):
        b = c * nb_per + i
        return (jnp.minimum(b, last_block), 0)        # clamp OOB logical blocks

    kernel = functools.partial(
        _argmax_flat_kernel, rows=rows, tile_rows=tile_rows, compute_dtype=cdt,
        neg=neg, key_fn=key_fn, needs_mask=needs_mask)

    vals, idxs = pl.pallas_call(
        kernel,
        out_shape=(jax.ShapeDtypeStruct((ncores * 8, _LANES), cdt),
                   jax.ShapeDtypeStruct((ncores * 8, _LANES), jnp.int32)),
        grid=(ncores, nb_per),
        in_specs=[pl.BlockSpec((tile_rows, _LANES), in_map)],
        out_specs=(pl.BlockSpec((8, _LANES), lambda c, i: (c, 0)),
                   pl.BlockSpec((8, _LANES), lambda c, i: (c, 0))),
        scratch_shapes=[pltpu.VMEM((1, _LANES), cdt),
                        pltpu.VMEM((1, _LANES), jnp.int32)],
        compiler_params=pltpu.CompilerParams(
            dimension_semantics=("parallel", "arbitrary"),
            vmem_limit_bytes=_VMEM_LIMIT),
    )(x2)

    cand_v = vals.reshape(-1)
    cand_i = idxs.reshape(-1)
    if tail:
        tkey = key_fn(flat[rows * _LANES:])
        t_idx = jnp.argmax(tkey).astype(jnp.int32) + np.int32(rows * _LANES)
        cand_v = jnp.concatenate([cand_v, jnp.max(tkey)[None]])
        cand_i = jnp.concatenate([cand_i, t_idx[None]])
    g = jnp.max(cand_v)
    return jnp.min(jnp.where(cand_v == g, cand_i, _INT32_MAX))


# ----------------------------------------------------------------------------
# dim = last axis
# ----------------------------------------------------------------------------
def _argmax_last_kernel(x_ref, o_ref, *, key_fn):
    key = key_fn(x_ref[...])                                   # (TR, D)
    m = jnp.max(key, axis=1, keepdims=True)
    idx = lax.broadcasted_iota(jnp.int32, key.shape, 1)
    cand = jnp.where(key == m, idx, _INT32_MAX)
    o_ref[...] = jnp.min(cand, axis=1, keepdims=True)          # (TR, 1)


def _argmax_last_simple(x2):
    """argmax over last axis of (R, D); natural orientation (D >= 128 / few rows)."""
    R, D = x2.shape
    _, _, key_fn = _key_spec(x2.dtype)
    itemsize = np.dtype(x2.dtype).itemsize
    cap = max(8, (_TILE_BYTES // max(1, D * itemsize)) // 8 * 8)
    tr = R if R <= cap else cap
    out = pl.pallas_call(
        functools.partial(_argmax_last_kernel, key_fn=key_fn),
        out_shape=jax.ShapeDtypeStruct((R, 1), jnp.int32),
        grid=(pl.cdiv(R, tr),),
        in_specs=[pl.BlockSpec((tr, D), lambda i: (i, 0))],
        out_specs=pl.BlockSpec((tr, 1), lambda i: (i, 0)),
        compiler_params=pltpu.CompilerParams(
            dimension_semantics=("parallel",),
            vmem_limit_bytes=_VMEM_LIMIT),
    )(x2)
    return out[:, 0]


def _argmax_last_t_kernel(x_ref, o_ref, *, key_fn):
    key = key_fn(x_ref[...])                                   # (TR, D) 32-bit
    key_t = key.T                                              # (D, TR) via XLU
    m = jnp.max(key_t, axis=0, keepdims=True)                  # (1, TR)
    idx = lax.broadcasted_iota(jnp.int32, key_t.shape, 0)
    cand = jnp.where(key_t == m, idx, _INT32_MAX)
    o_ref[...] = jnp.min(cand, axis=0, keepdims=True)          # (1, TR) lane-dense


def _argmax_last_packed(x2):
    """argmax over last axis of (R, D) with D < 128, R >= 128: lane-dense output."""
    R, D = x2.shape
    _, _, key_fn = _key_spec(x2.dtype)
    tr = min(2048, (R // _LANES) * _LANES)                     # multiple of 128
    out = pl.pallas_call(
        functools.partial(_argmax_last_t_kernel, key_fn=key_fn),
        out_shape=jax.ShapeDtypeStruct((1, R), jnp.int32),
        grid=(pl.cdiv(R, tr),),
        in_specs=[pl.BlockSpec((tr, D), lambda i: (i, 0))],
        out_specs=pl.BlockSpec((1, tr), lambda i: (0, i)),
        compiler_params=pltpu.CompilerParams(
            dimension_semantics=("parallel",),
            vmem_limit_bytes=_VMEM_LIMIT),
    )(x2)
    return out[0, :]


# ----------------------------------------------------------------------------
# dim = non-last axis : sublane reduction, lane-dense output, no transpose,
#                       pre-tiling + d-streaming with a running accumulator.
# ----------------------------------------------------------------------------
def _argmax_sublane_kernel(x_ref, o_ref, run_val, run_idx, *, d, td,
                           compute_dtype, neg, key_fn, needs_mask):
    k = pl.program_id(2)                       # reduction-axis stream (last axis)

    @pl.when(k == 0)
    def _():
        run_val[...] = jnp.full(run_val.shape, neg, compute_dtype)
        run_idx[...] = jnp.full(run_idx.shape, _INT32_MAX, jnp.int32)

    key = key_fn(x_ref[...])                                   # (TPRE, TD, TP)
    dl = lax.broadcasted_iota(jnp.int32, key.shape, 1)         # local d index
    if needs_mask:
        key = jnp.where(k * td + dl < d, key, neg)

    m = jnp.max(key, axis=1)                                   # (TPRE, TP)
    cand = jnp.where(key == m[:, None, :], dl, _INT32_MAX)
    blk_idx = jnp.min(cand, axis=1) + k * td                   # (TPRE, TP)

    better = (m > run_val[...]) | ((m == run_val[...]) &
                                   (blk_idx < run_idx[...]))
    run_val[...] = jnp.where(better, m, run_val[...])
    run_idx[...] = jnp.where(better, blk_idx, run_idx[...])

    @pl.when(k == pl.num_programs(2) - 1)
    def _():
        o_ref[...] = run_idx[...]


def _argmax_sublane_axis(x3):
    """argmax over axis 1 of (pre, d, post) -> (pre, post) int32."""
    pre, d, post = x3.shape
    cdt, neg, key_fn = _key_spec(x3.dtype)
    itemsize = np.dtype(x3.dtype).itemsize

    # lanes: keep the big trailing dims lane-dense
    tp = min(post, 512) if post % _LANES == 0 else post
    # pre tile (output block rule: multiple of 8 or == pre)
    if pre <= 8:
        tpre = pre
    else:
        cap_pre = max(8, (_TILE_BYTES // max(1, d * tp * itemsize)) // 8 * 8)
        tpre = max(8, min((pre // 8) * 8, cap_pre, 256))
    # reduction-axis tile: stream d when the full axis exceeds the budget
    cap_d = _TILE_BYTES // max(1, tpre * tp * itemsize)
    td = d if cap_d >= d else max(8, (cap_d // 8) * 8)
    nd = pl.cdiv(d, td)
    needs_mask = (nd * td) != d

    kernel = functools.partial(
        _argmax_sublane_kernel, d=d, td=td, compute_dtype=cdt, neg=neg,
        key_fn=key_fn, needs_mask=needs_mask)

    out = pl.pallas_call(
        kernel,
        out_shape=jax.ShapeDtypeStruct((pre, post), jnp.int32),
        grid=(pl.cdiv(pre, tpre), pl.cdiv(post, tp), nd),
        in_specs=[pl.BlockSpec((tpre, td, tp), lambda p, j, k: (p, k, j))],
        out_specs=pl.BlockSpec((tpre, tp), lambda p, j, k: (p, j)),
        scratch_shapes=[pltpu.VMEM((tpre, tp), cdt),
                        pltpu.VMEM((tpre, tp), jnp.int32)],
        compiler_params=pltpu.CompilerParams(
            dimension_semantics=("parallel", "parallel", "arbitrary"),
            vmem_limit_bytes=_VMEM_LIMIT),
    )(x3)
    return out


def _argmax_axis(x, dim):
    axis = dim % x.ndim
    shape = x.shape
    d = shape[axis]
    pre = math.prod(shape[:axis]) if axis > 0 else 1
    post = math.prod(shape[axis + 1:]) if axis + 1 < x.ndim else 1
    out_shape = shape[:axis] + shape[axis + 1:]
    if post == 1:
        x2 = x.reshape(pre, d)
        if d < _LANES and pre >= _LANES:
            out = _argmax_last_packed(x2)     # lane-dense output, small D
        else:
            out = _argmax_last_simple(x2)
    else:
        # Keep big trailing dims on lanes; reduce over sublanes in-kernel.
        out = _argmax_sublane_axis(x.reshape(pre, d, post))
    return out.reshape(out_shape).astype(jnp.int32)


# ----------------------------------------------------------------------------
# Module (mirrors the PyTorch ArgMax)
# ----------------------------------------------------------------------------
class ArgMax:
    def __init__(self, dim=None):
        self.dim = dim

    def __call__(self, x):
        if self.dim is None:
            return _argmax_flat(x)
        return _argmax_axis(x, self.dim)


# ----------------------------------------------------------------------------
# Demo / self-check
# ----------------------------------------------------------------------------
if __name__ == "__main__":
    key = jax.random.PRNGKey(0)
    x = jax.random.normal(key, (2, 4, 16, 16), dtype=jnp.float32)  # NCHW

    # dim=None (flattened argmax, streaming)
    y = jax.block_until_ready(ArgMax()(x))
    assert int(y) == int(jnp.argmax(x)), (int(y), int(jnp.argmax(x)))

    # dim=1 (channel argmax: sublane reduction, lane-dense output)
    y = jax.block_until_ready(ArgMax(dim=1)(x))
    np.testing.assert_array_equal(np.asarray(y), np.asarray(jnp.argmax(x, axis=1)))

    # dim=0
    y = jax.block_until_ready(ArgMax(dim=0)(x))
    np.testing.assert_array_equal(np.asarray(y), np.asarray(jnp.argmax(x, axis=0)))

    # dim=2 (middle spatial axis)
    y = jax.block_until_ready(ArgMax(dim=2)(x))
    np.testing.assert_array_equal(np.asarray(y), np.asarray(jnp.argmax(x, axis=2)))

    # dim=-1 (last axis; D < 128 with many rows -> lane-dense transposed path)
    y = jax.block_until_ready(ArgMax(dim=-1)(x))
    np.testing.assert_array_equal(np.asarray(y), np.asarray(jnp.argmax(x, axis=-1)))

    # flattened argmax on a size not divisible by 128 (exercises tail handling)
    x2 = jax.random.normal(jax.random.PRNGKey(1), (3, 5, 7), dtype=jnp.float32)
    y = jax.block_until_ready(ArgMax()(x2))
    assert int(y) == int(jnp.argmax(x2)), (int(y), int(jnp.argmax(x2)))

    # integer input (exact int32 comparison path, first-occurrence tie-break)
    xi = jax.random.randint(jax.random.PRNGKey(2), (4, 9, 13), -1000, 1000,
                            dtype=jnp.int32)
    y = jax.block_until_ready(ArgMax()(xi))
    assert int(y) == int(jnp.argmax(xi)), (int(y), int(jnp.argmax(xi)))
    y = jax.block_until_ready(ArgMax(dim=-1)(xi))
    np.testing.assert_array_equal(np.asarray(y), np.asarray(jnp.argmax(xi, axis=-1)))

    print("KERNEL_OK")
</pallas_src>

<mosaic_0001>
module attributes {stable_mosaic.version = 11 : i64} {
  func.func @_argmax_flat_kernel(%arg0: i32, %arg1: i32, %arg2: memref<16x128xf32, #tpu.memory_space<vmem>>, %arg3: memref<8x128xf32, #tpu.memory_space<vmem>>, %arg4: memref<8x128xi32, #tpu.memory_space<vmem>>, %arg5: memref<1x128xf32, #tpu.memory_space<vmem>>, %arg6: memref<1x128xi32, #tpu.memory_space<vmem>>) attributes {dimension_semantics = [#tpu.dimension_semantics<parallel>, #tpu.dimension_semantics<arbitrary>], iteration_bounds = array<i64: 1, 1>, scalar_prefetch = 0 : i64, scratch_operands = 2 : i64, tpu.core_type = #tpu.core_type<tc>, window_params = [{transform_indices = @transform_0, window_bounds = array<i64: 16, 128>}, {transform_indices = @transform_1, window_bounds = array<i64: 8, 128>}, {transform_indices = @transform_2, window_bounds = array<i64: 8, 128>}]} {
    %c1_i32 = arith.constant 1 : i32
    %0 = arith.muli %arg0, %c1_i32 : i32
    %1 = arith.addi %0, %arg1 : i32
    %c0_i32 = arith.constant 0 : i32
    %2 = arith.cmpi eq, %arg1, %c0_i32 : i32
    %3 = arith.extui %2 : i1 to i32
    %c0_i32_0 = arith.constant 0 : i32
    %4 = arith.cmpi ne, %3, %c0_i32_0 : i32
    scf.if %4 {
      %cst_20 = arith.constant 0xFF800000 : f32
      %42 = vector.broadcast %cst_20 : f32 to vector<1x128xf32>
      %c0_21 = arith.constant 0 : index
      %c0_22 = arith.constant 0 : index
      %43 = vector.load %arg5[%c0_21, %c0_22] : memref<1x128xf32, #tpu.memory_space<vmem>>, vector<1x128xf32>
      tpu.vector_store %arg5[%c0_21, %c0_22], %42 {strides = array<i32>} : memref<1x128xf32, #tpu.memory_space<vmem>>, vector<1x128xf32>,
      %c2147483647_i32_23 = arith.constant 2147483647 : i32
      %44 = vector.broadcast %c2147483647_i32_23 : i32 to vector<1x128xi32>
      %c0_24 = arith.constant 0 : index
      %c0_25 = arith.constant 0 : index
      %45 = vector.load %arg6[%c0_24, %c0_25] : memref<1x128xi32, #tpu.memory_space<vmem>>, vector<1x128xi32>
      tpu.vector_store %arg6[%c0_24, %c0_25], %44 {strides = array<i32>} : memref<1x128xi32, #tpu.memory_space<vmem>>, vector<1x128xi32>,
    } else {
    }
    %c0 = arith.constant 0 : index
    %c0_1 = arith.constant 0 : index
    %5 = vector.load %arg2[%c0, %c0_1] : memref<16x128xf32, #tpu.memory_space<vmem>>, vector<16x128xf32>
    %6 = arith.cmpf one, %5, %5 : vector<16x128xf32>
    %cst = arith.constant 0x7F800000 : f32
    %7 = vector.broadcast %cst : f32 to vector<16x128xf32>
    %8 = arith.select %6, %7, %5 : vector<16x128xi1>, vector<16x128xf32>
    %9 = tpu.iota {dimensions = array<i32: 0>} : vector<16x128xi32>
    %cst_2 = arith.constant dense<0xFF800000> : vector<128xf32>
    %10 = vector.multi_reduction <maximumf>, %8, %cst_2 [0] : vector<16x128xf32> to vector<128xf32>
    %11 = vector.shape_cast %10 : vector<128xf32> to vector<1x128xf32>
    %12 = vector.broadcast %11 : vector<1x128xf32> to vector<16x128xf32>
    %13 = arith.cmpf oeq, %8, %12 : vector<16x128xf32>
    %c2147483647_i32 = arith.constant 2147483647 : i32
    %14 = vector.broadcast %c2147483647_i32 : i32 to vector<16x128xi32>
    %15 = arith.select %13, %9, %14 : vector<16x128xi1>, vector<16x128xi32>
    %cst_3 = arith.constant dense<2147483647> : vector<128xi32>
    %16 = vector.multi_reduction <minsi>, %15, %cst_3 [0] : vector<16x128xi32> to vector<128xi32>
    %17 = vector.shape_cast %16 : vector<128xi32> to vector<1x128xi32>
    %18 = tpu.iota {dimensions = array<i32: 1>} : vector<1x128xi32>
    %c16_i32 = arith.constant 16 : i32
    %19 = arith.muli %1, %c16_i32 : i32
    %20 = vector.broadcast %19 : i32 to vector<1x128xi32>
    %21 = arith.addi %17, %20 : vector<1x128xi32>
    %c128_i32 = arith.constant 128 : i32
    %22 = vector.broadcast %c128_i32 : i32 to vector<1x128xi32>
    %23 = arith.muli %21, %22 : vector<1x128xi32>
    %24 = arith.addi %23, %18 : vector<1x128xi32>
    %c0_4 = arith.constant 0 : index
    %c0_5 = arith.constant 0 : index
    %25 = vector.load %arg5[%c0_4, %c0_5] : memref<1x128xf32, #tpu.memory_space<vmem>>, vector<1x128xf32>
    %26 = arith.cmpf ogt, %11, %25 : vector<1x128xf32>
    %c0_6 = arith.constant 0 : index
    %c0_7 = arith.constant 0 : index
    %27 = vector.load %arg5[%c0_6, %c0_7] : memref<1x128xf32, #tpu.memory_space<vmem>>, vector<1x128xf32>
    %28 = arith.cmpf oeq, %11, %27 : vector<1x128xf32>
    %c0_8 = arith.constant 0 : index
    %c0_9 = arith.constant 0 : index
    %29 = vector.load %arg6[%c0_8, %c0_9] : memref<1x128xi32, #tpu.memory_space<vmem>>, vector<1x128xi32>
    %30 = arith.cmpi slt, %24, %29 : vector<1x128xi32>
    %31 = arith.andi %28, %30 : vector<1x128xi1>
    %32 = arith.ori %26, %31 : vector<1x128xi1>
    %c0_10 = arith.constant 0 : index
    %c0_11 = arith.constant 0 : index
    %33 = vector.load %arg5[%c0_10, %c0_11] : memref<1x128xf32, #tpu.memory_space<vmem>>, vector<1x128xf32>
    %34 = arith.select %32, %11, %33 : vector<1x128xi1>, vector<1x128xf32>
    %c0_12 = arith.constant 0 : index
    %c0_13 = arith.constant 0 : index
    %35 = vector.load %arg5[%c0_12, %c0_13] : memref<1x128xf32, #tpu.memory_space<vmem>>, vector<1x128xf32>
    tpu.vector_store %arg5[%c0_12, %c0_13], %34 {strides = array<i32>} : memref<1x128xf32, #tpu.memory_space<vmem>>, vector<1x128xf32>,
    %c0_14 = arith.constant 0 : index
    %c0_15 = arith.constant 0 : index
    %36 = vector.load %arg6[%c0_14, %c0_15] : memref<1x128xi32, #tpu.memory_space<vmem>>, vector<1x128xi32>
    %37 = arith.select %32, %24, %36 : vector<1x128xi1>, vector<1x128xi32>
    %c0_16 = arith.constant 0 : index
    %c0_17 = arith.constant 0 : index
    %38 = vector.load %arg6[%c0_16, %c0_17] : memref<1x128xi32, #tpu.memory_space<vmem>>, vector<1x128xi32>
    tpu.vector_store %arg6[%c0_16, %c0_17], %37 {strides = array<i32>} : memref<1x128xi32, #tpu.memory_space<vmem>>, vector<1x128xi32>,
    %c0_i32_18 = arith.constant 0 : i32
    %39 = arith.cmpi eq, %arg1, %c0_i32_18 : i32
    %40 = arith.extui %39 : i1 to i32
    %c0_i32_19 = arith.constant 0 : i32
    %41 = arith.cmpi ne, %40, %c0_i32_19 : i32
    scf.if %41 {
      %c0_20 = arith.constant 0 : index
      %c0_21 = arith.constant 0 : index
      %42 = vector.load %arg5[%c0_20, %c0_21] : memref<1x128xf32, #tpu.memory_space<vmem>>, vector<1x128xf32>
      %43 = vector.shape_cast %42 : vector<1x128xf32> to vector<1x128xf32>
      %44 = vector.broadcast %43 : vector<1x128xf32> to vector<8x128xf32>
      %c0_22 = arith.constant 0 : index
      %c0_23 = arith.constant 0 : index
      %45 = vector.load %arg3[%c0_22, %c0_23] : memref<8x128xf32, #tpu.memory_space<vmem>>, vector<8x128xf32>
      tpu.vector_store %arg3[%c0_22, %c0_23], %44 {strides = array<i32>} : memref<8x128xf32, #tpu.memory_space<vmem>>, vector<8x128xf32>,
      %c0_24 = arith.constant 0 : index
      %c0_25 = arith.constant 0 : index
      %46 = vector.load %arg6[%c0_24, %c0_25] : memref<1x128xi32, #tpu.memory_space<vmem>>, vector<1x128xi32>
      %47 = vector.shape_cast %46 : vector<1x128xi32> to vector<1x128xi32>
      %48 = vector.broadcast %47 : vector<1x128xi32> to vector<8x128xi32>
      %c0_26 = arith.constant 0 : index
      %c0_27 = arith.constant 0 : index
      %49 = vector.load %arg4[%c0_26, %c0_27] : memref<8x128xi32, #tpu.memory_space<vmem>>, vector<8x128xi32>
      tpu.vector_store %arg4[%c0_26, %c0_27], %48 {strides = array<i32>} : memref<8x128xi32, #tpu.memory_space<vmem>>, vector<8x128xi32>,
    } else {
    }
    return
  }
  func.func @transform_0(%arg0: i32, %arg1: i32) -> (i32, i32) {
    %c1_i32 = arith.constant 1 : i32
    %0 = arith.muli %arg0, %c1_i32 : i32
    %1 = arith.addi %0, %arg1 : i32
    %c0_i32 = arith.constant 0 : i32
    %2 = arith.minsi %1, %c0_i32 : i32
    %c0_i32_0 = arith.constant 0 : i32
    %c0_i32_1 = arith.constant 0 : i32
    return %2, %c0_i32_0 : i32, i32
  }
  func.func @transform_1(%arg0: i32, %arg1: i32) -> (i32, i32) {
    %c0_i32 = arith.constant 0 : i32
    %c0_i32_0 = arith.constant 0 : i32
    return %arg0, %c0_i32 : i32, i32
  }
  func.func @transform_2(%arg0: i32, %arg1: i32) -> (i32, i32) {
    %c0_i32 = arith.constant 0 : i32
    %c0_i32_0 = arith.constant 0 : i32
    return %arg0, %c0_i32 : i32, i32
  }
}

</mosaic_0001>

<bundles_post_ra>
// kernel: tpu_custom_call.1
= control target key start
LH: loop header
LB: loop body
LE: loop exit
PB: predicated region body
PF: predicated region fallthrough
CT: control target
= control target key end

     0   :  { %8 = vsyncpa [#allocation5], 0  ;;  %s247_s0 = inlined_call_operand.hbm [shape: f32[16,128], index: 0, kind: input, shape index: {}]   ;;  %s248_s1 = inlined_call_operand.hbm [shape: f32[8,128], index: 1, kind: output, shape index: {0}]   ;;  %s249_s2 = inlined_call_operand.hbm [shape: s32[8,128], index: 2, kind: output, shape index: {1}]  }
   0x1   :  { %9 = vsyncpa [#allocation6], 0 }
   0x2   :  { %10 = vsyncpa [#allocation9], 0  ;;  %s216_s9 = smov [#allocation4]  }
   0x3   :  { %s22_s10 = sshll.u32 %s216_s9, 4  ;;  %s23_s10 = int_to_ptr.vmem [resolvable:$true] %s22_s10 }
   0x4   :  { %s158_s11 = scalar_lea.vmem %s23_s10, 256  ;;  %p163_p1 = scmp.lt.s32.totalorder %s23_s10, %s23_s10 }
   0x5   :  { %p159_p0 = scmp.ne.s32.totalorder %s23_s10, %s158_s11  ;;  %p164_p2 = scmp.lt.s32.totalorder %s158_s11, %s158_s11 }
   0x7   :  { %p165_p3 = por %p164_p2, %p163_p1 }
   0x9   :  { %p166_p4 = pnand %p165_p3, %p159_p0 }
   0xb   :  { %169 = shalt.err (!%p166_p4)
}
   0xc   :  { %s217_s12 = smov 128   ;;  %s218_s13 = smov 8  }
   0xd   :  { %28 = dma.hbm_to_vmem [thread:$0]  %s247_s0, 256, %s23_s10, [#allocation5], %s217_s12, %s217_s12, %s218_s13  }
   0xe   :  { %210 = dma.done.wait [#allocation5], 256  }
   0xf   :  { %211 = vsyncadd [#allocation5], 4294967040  ;;  %v219_v0 = vmov -inf   ;;  %v220_v1 = vmov 2147483647   ;;  %v43_v2 = vld [vmem:[#allocation4] sm:$0xff]  ;;  %v49_v8 = vlaneseq }
  0x10   :  { %41 = vst [vmem:[#allocation2] sm:$0x1] %v219_v0  ;;  %42 = vst [vmem:[#allocation3] sm:$0x1] %v220_v1  ;;  %v44_v3 = vld [vmem:[#allocation4 + $0x8] sm:$0xff]  ;;  %vm45_vm0 = vcmp.ne.f32.partialorder %v43_v2, %v43_v2  ;;  %s221_s0 = smov [#allocation7]  }
  0x11   :  { %vm46_vm1 = vcmp.ne.f32.partialorder %v44_v3, %v44_v3  ;;  %v47_v4 = vsel %vm45_vm0, inf, %v43_v2  ;;  %v50_v11 = vshrl.u32 %v49_v8, 7  ;;  %v75_v24 = vand.u32 127, %v49_v8  ;;  %s116_s16 = sshll.u32 %s221_s0, 4  ;;  %s222_s17 = smov [#allocation8]   ;;  %s117_s16 = int_to_ptr.vmem [resolvable:$true] %s116_s16 }
  0x12   :  { %v48_v5 = vsel %vm46_vm1, inf, %v44_v3  ;;  %s126_s18 = sshll.u32 %s222_s17, 4  ;;  %s170_s19 = scalar_lea.vmem %s117_s16, 128  ;;  %s127_s18 = int_to_ptr.vmem [resolvable:$true] %s126_s18 }
  0x13   :  { %v52_v6 = vmax.f32 %v47_v4, %v48_v5  ;;  %v51_v14 = vadd.s32 8, %v50_v11  ;;  %p171_p5 = scmp.ne.s32.totalorder %s117_s16, %s170_s19  ;;  %p175_p6 = scmp.lt.s32.totalorder %s117_s16, %s117_s16 }
  0x14   :  { %p176_p7 = scmp.lt.s32.totalorder %s170_s19, %s170_s19 }
  0x15   :  { %v53_v7 = vrot.slane %v52_v6, 4 }
  0x16   :  { %p177_p8 = por %p176_p7, %p175_p6 }
  0x17   :  { %v54_v9 = vmax.f32 %v52_v6, %v53_v7  ;;  %v81_v26 = vld [vmem:[#allocation2] sm:$0x1]  ;;  %v84_v28 = vld [vmem:[#allocation3] sm:$0x1] }
  0x18   :  { %v90_v30 = vld [vmem:[#allocation3] sm:$0x1]  ;;  %p178_p9 = pnand %p177_p8, %p171_p5 }
  0x19   :  { %v55_v10 = vrot.slane %v54_v9, 2 }
  0x1b   :  { %v56_v12 = vmax.f32 %v54_v9, %v55_v10 }
  0x1d   :  { %v57_v13 = vrot.slane %v56_v12, 1 }
  0x1f   :  { %v58_v15 = vmax.f32 %v56_v12, %v57_v13 }
  0x21   :  { %vm59_vm2 = vcmp.eq.f32.partialorder %v47_v4, %v58_v15  ;;  %vm60_vm3 = vcmp.eq.f32.partialorder %v48_v5, %v58_v15  ;;  %vm83_vm8 = vcmp.eq.f32.partialorder %v58_v15, %v81_v26  ;;  %vm82_vm9 = vcmp.gt.f32.partialorder %v58_v15, %v81_v26 }
  0x22   :  { %v61_v16 = vsel %vm59_vm2, %v50_v11, 2147483647  ;;  %v62_v17 = vsel %vm60_vm3, %v51_v14, 2147483647 }
  0x23   :  { %vm63_vm4 = vcmp.lt.s32.totalorder %v61_v16, %v62_v17 }
  0x24   :  { %v64_v18 = vsel %vm63_vm4, %v61_v16, %v62_v17 }
  0x25   :  { %v65_v19 = vrot.slane %v64_v18, 4 }
  0x27   :  { %vm66_vm5 = vcmp.lt.s32.totalorder %v64_v18, %v65_v19 }
  0x28   :  { %v67_v20 = vsel %vm66_vm5, %v64_v18, %v65_v19 }
  0x29   :  { %v68_v21 = vrot.slane %v67_v20, 2 }
  0x2b   :  { %vm69_vm6 = vcmp.lt.s32.totalorder %v67_v20, %v68_v21 }
  0x2c   :  { %v70_v22 = vsel %vm69_vm6, %v67_v20, %v68_v21 }
  0x2d   :  { %v71_v23 = vrot.slane %v70_v22, 1 }
  0x2f   :  { %vm72_vm7 = vcmp.lt.s32.totalorder %v70_v22, %v71_v23 }
  0x30   :  { %v73_v25 = vsel %vm72_vm7, %v70_v22, %v71_v23 }
  0x31   :  { %v79_v27 = vmul.u32 128, %v73_v25 }
  0x33   :  { %v80_v29 = vadd.s32 %v79_v27, %v75_v24 }
  0x35   :  { %vm85_vm10 = vcmp.lt.s32.totalorder %v80_v29, %v84_v28 }
  0x36   :  { %vm86_vm11 = vmand %vm83_vm8, %vm85_vm10 }
  0x37   :  { %vm87_vm12 = vmor %vm82_vm9, %vm86_vm11 }
  0x38   :  { %v88_v31 = vsel %vm87_vm12, %v58_v15, %v81_v26  ;;  %v91_v32 = vsel %vm87_vm12, %v80_v29, %v90_v30 }
  0x39   :  { %89 = vst [vmem:[#allocation2] sm:$0x1] %v88_v31  ;;  %92 = vst [vmem:[#allocation3] sm:$0x1] %v91_v32 }
  0x40   :  { %v141_v33 = vld [vmem:[#allocation2] ss:$0 sm:$0xff]  ;;  %v142_v34 = vld [vmem:[#allocation3] ss:$0 sm:$0xff] }
  0x41   :  { %103 = vst [vmem:[#allocation7] sm:$0xff] %v141_v33  ;;  %109 = vst [vmem:[#allocation8] sm:$0xff] %v142_v34 }
  0x42   :  { %181 = shalt.err (!%p178_p9)
}
  0x43   :  { %119 = dma.vmem_to_hbm [thread:$0]  %s117_s16, 128, %s248_s1, [#allocation6]  }
  0x44   :  { %s190_s22 = scalar_lea.vmem %s127_s18, 128  ;;  %p195_p11 = scmp.lt.s32.totalorder %s127_s18, %s127_s18 }
  0x45   :  { %p191_p10 = scmp.ne.s32.totalorder %s127_s18, %s190_s22  ;;  %p196_p12 = scmp.lt.s32.totalorder %s190_s22, %s190_s22 }
  0x47   :  { %p197_p13 = por %p196_p12, %p195_p11 }
  0x49   :  { %p198_p0 = pnand %p197_p13, %p191_p10 }
  0x4b   :  { %201 = shalt.err (!%p198_p0)
}
  0x4c   :  { %129 = dma.vmem_to_hbm [thread:$0]  %s127_s18, 128, %s249_s2, [#allocation9]  }
  0x4d   :  { %212 = dma.done.wait [#allocation6], 128  }
  0x4e   :  { %213 = vsyncadd [#allocation6], 4294967168 }
  0x4f   :  { %214 = dma.done.wait [#allocation9], 128  }
  0x50   :  { %215 = vsyncadd [#allocation9], 4294967168 }
  0x51   :  { %136 = vsyncpa [#allocation5], 1 }
  0x52   :  { %137 = vsyncpa [#allocation6], 1 }
  0x53   :  { %138 = vsyncpa [#allocation9], 1 }

</bundles_post_ra>
